<compile_context>
chip_gen: v6e
topology: v6e:2x2x1
jax: 0.10.0
libtpu: 0.0.40
codegen_flags: <defaults>
</compile_context>

<pallas_src>
import functools

import jax
import jax.numpy as jnp
from jax.experimental import pallas as pl
from jax.experimental.pallas import tpu as pltpu


def _round_up(x, m):
    return (x + m - 1) // m * m


def _gather_chunk_kernel(src_rows_ref, x_hbm_ref, o_ref, sem, *,
                         rows_per_chunk, max_inflight):
    """Gather `rows_per_chunk` rows from HBM into the (G, C) output tile.

    src_rows_ref : SMEM int32[n_padded]  scalar-prefetched source-row ids
    x_hbm_ref    : HBM  (R, C)           raw input (memory_space=pl.ANY)
    o_ref        : VMEM (G, C)           auto-pipelined output tile
    sem          : DMA semaphores, shape (max_inflight,)
    """
    G = rows_per_chunk
    W = min(max_inflight, G)          # copies kept in flight
    base = pl.program_id(0) * G

    def issue(j):
        row = src_rows_ref[base + j]
        pltpu.make_async_copy(x_hbm_ref.at[row], o_ref.at[j],
                              sem.at[j % W]).start()

    def wait_slot(slot):
        # Every row copy has identical byte count, so any row works as the
        # wait descriptor for that slot's semaphore.
        pltpu.make_async_copy(x_hbm_ref.at[0], o_ref.at[0],
                              sem.at[slot]).wait()

    # Prime W copies in flight.
    @pl.loop(0, W)
    def _prime(j):
        issue(j)

    # Steady state: retire the copy issued W steps ago, then issue a new one.
    @pl.loop(W, G)
    def _steady(j):
        wait_slot(j % W)
        issue(j)

    # Drain: exactly one outstanding copy per slot remains.
    @pl.loop(0, W)
    def _drain(s):
        wait_slot(s)
    # All rows of o_ref are now valid; the pipeline writes the tile back.


def _pallas_row_gather(patches_flat, src_rows, n_out_rows, *,
                       chunk_rows=512, max_inflight=8):
    """Gather `n_out_rows` rows of (R, C) `patches_flat` at `src_rows`."""
    _, C = patches_flat.shape
    if n_out_rows == 0:
        return jnp.zeros((0, C), dtype=patches_flat.dtype)

    # Chunk of G rows per grid step; keep G a multiple of 8 (sublane tiling)
    # unless a single chunk covers everything.
    G = min(chunk_rows, _round_up(n_out_rows, 8))
    n_padded = _round_up(n_out_rows, G)
    num_chunks = n_padded // G

    # Pad the index table; padded entries gather row 0 (harmless, sliced off).
    src_rows_padded = jnp.zeros((n_padded,), dtype=jnp.int32)
    src_rows_padded = src_rows_padded.at[:n_out_rows].set(
        src_rows.astype(jnp.int32))

    out = pl.pallas_call(
        functools.partial(_gather_chunk_kernel,
                          rows_per_chunk=G, max_inflight=max_inflight),
        out_shape=jax.ShapeDtypeStruct((n_padded, C), patches_flat.dtype),
        grid_spec=pltpu.PrefetchScalarGridSpec(
            num_scalar_prefetch=1,
            grid=(num_chunks,),
            in_specs=[pl.BlockSpec(memory_space=pl.ANY)],   # raw HBM, no auto-DMA
            out_specs=pl.BlockSpec((G, C), lambda i, src_rows: (i, 0)),
            scratch_shapes=[pltpu.SemaphoreType.DMA((max_inflight,))],
        ),
        compiler_params=pltpu.CompilerParams(
            # Chunks are independent: lets v7x shard them across both TCs;
            # no-op on v5e/v6e.
            dimension_semantics=("parallel",)),
    )(src_rows_padded, patches_flat)
    return out[:n_out_rows]


def patch_shuffle(patches, ratio, key):
    """JAX/Pallas equivalent of PatchShuffle.forward.

    patches: (T, B, C)
    returns: (shuffled_patches[(remain_T, B, C)],
              forward_indexes[(T, B)], backward_indexes[(T, B)])
    """
    T, B, C = patches.shape
    remain_T = int(T * (1 - ratio))   # same float-truncation as the PyTorch module

    # Per-batch independent uniform permutations of [0, T), fully vectorized:
    # argsort of iid uniform noise along T is a uniform random permutation per
    # column (replaces B separate jax.random.permutation calls).
    noise = jax.random.uniform(key, (T, B))
    forward_indexes = jnp.argsort(noise, axis=0).astype(jnp.int32)          # (T, B)
    backward_indexes = jnp.argsort(forward_indexes, axis=0).astype(jnp.int32)
    # NOTE: PyTorch returns int64 indexes; int32 is used here (TPU-friendly).

    # Flatten (T, B, C) -> (T*B, C) row-major; source row for output (t, b)
    # is forward_indexes[t, b] * B + b.
    # TODO(synk): for best DMA efficiency C should be a multiple of 128
    # (lane axis); arbitrary C still works, just with ragged row copies.
    patches_flat = patches.reshape(T * B, C)
    src_rows = (forward_indexes[:remain_T] * B
                + jnp.arange(B, dtype=jnp.int32)[None, :]).reshape(-1)

    out_flat = _pallas_row_gather(patches_flat, src_rows, remain_T * B)
    shuffled = out_flat.reshape(remain_T, B, C)
    return shuffled, forward_indexes, backward_indexes


if __name__ == "__main__":
    T, B, C = 16, 2, 128
    ratio = 0.5

    key = jax.random.PRNGKey(0)
    k_data, k_perm = jax.random.split(key)
    patches = jax.random.normal(k_data, (T, B, C), dtype=jnp.float32)

    shuffled, fwd, bwd = patch_shuffle(patches, ratio, k_perm)
    shuffled = jax.block_until_ready(shuffled)

    remain_T = int(T * (1 - ratio))
    # Pure-JAX reference of take_indexes(...)[:remain_T]
    ref = jnp.take_along_axis(patches, fwd[:remain_T, :, None], axis=0)

    assert shuffled.shape == (remain_T, B, C)
    assert fwd.shape == (T, B) and bwd.shape == (T, B)
    # Each column of fwd is a permutation of [0, T).
    assert bool(jnp.all(jnp.sort(fwd, axis=0)
                        == jnp.arange(T, dtype=jnp.int32)[:, None]))
    # backward o forward == identity, per batch column (broadcast compare).
    ident = jnp.take_along_axis(fwd, bwd, axis=0)
    assert bool(jnp.all(ident == jnp.arange(T, dtype=jnp.int32)[:, None]))
    # Kernel output matches the gather reference exactly (pure row copy).
    assert bool(jnp.all(shuffled == ref))

    print("KERNEL_OK")
</pallas_src>

<mosaic_0001>
module attributes {stable_mosaic.version = 11 : i64} {
  func.func @_gather_chunk_kernel(%arg0: i32, %arg1: memref<16xi32, #tpu.memory_space<smem>>, %arg2: memref<32x128xf32, #tpu.memory_space<any>>, %arg3: memref<16x128xf32, #tpu.memory_space<vmem>>, %arg4: memref<8x!tpu.dma_semaphore, #tpu.memory_space<semaphore_mem>>) attributes {dimension_semantics = [#tpu.dimension_semantics<parallel>], iteration_bounds = array<i64: 1>, scalar_prefetch = 1 : i64, scratch_operands = 1 : i64, tpu.core_type = #tpu.core_type<tc>, window_params = [{}, {transform_indices = @transform_1, window_bounds = array<i64: 16, 128>}]} {
    %c16_i32 = arith.constant 16 : i32
    %0 = arith.muli %arg0, %c16_i32 : i32
    %c0_i32 = arith.constant 0 : i32
    %c8_i32 = arith.constant 8 : i32
    %1 = arith.addi %c0_i32, %c8_i32 : i32
    %c1_i32 = arith.constant 1 : i32
    scf.for %arg5 = %c0_i32 to %1 step %c1_i32  : i32 {
      %c1_i32_9 = arith.constant 1 : i32
      %4 = arith.muli %arg5, %c1_i32_9 : i32
      %c0_i32_10 = arith.constant 0 : i32
      %5 = arith.addi %c0_i32_10, %4 : i32
      %6 = arith.addi %0, %5 : i32
      %7 = arith.index_cast %6 : i32 to index
      %8 = memref.load %arg1[%7] : memref<16xi32, #tpu.memory_space<smem>>
      %c8_i32_11 = arith.constant 8 : i32
      %c0_i32_12 = arith.constant 0 : i32
      %9 = arith.cmpi eq, %c8_i32_11, %c0_i32_12 : i32
      %c1_i32_13 = arith.constant 1 : i32
      %10 = arith.select %9, %c1_i32_13, %c8_i32_11 : i32
      %11 = arith.remsi %5, %10 : i32
      %c0_i32_14 = arith.constant 0 : i32
      %12 = arith.cmpi ne, %11, %c0_i32_14 : i32
      %c0_i32_15 = arith.constant 0 : i32
      %13 = arith.cmpi slt, %11, %c0_i32_15 : i32
      %c0_i32_16 = arith.constant 0 : i32
      %14 = arith.cmpi slt, %10, %c0_i32_16 : i32
      %15 = arith.xori %13, %14 : i1
      %16 = arith.andi %15, %12 : i1
      %17 = arith.addi %11, %10 : i32
      %18 = arith.select %16, %17, %11 : i32
      %c0_i32_17 = arith.constant 0 : i32
      %19 = tpu.memref_slice %arg2[%8, %c0_i32_17] : memref<32x128xf32, #tpu.memory_space<any>> -> memref<1x128xf32, #tpu.memory_space<any>>
      %20 = tpu.memref_squeeze %19 : memref<1x128xf32, #tpu.memory_space<any>> -> memref<128xf32, #tpu.memory_space<any>>
      %c0_i32_18 = arith.constant 0 : i32
      %21 = tpu.memref_slice %arg3[%5, %c0_i32_18] : memref<16x128xf32, #tpu.memory_space<vmem>> -> memref<1x128xf32, #tpu.memory_space<vmem>>
      %22 = tpu.memref_squeeze %21 : memref<1x128xf32, #tpu.memory_space<vmem>> -> memref<128xf32, #tpu.memory_space<vmem>>
      %23 = tpu.memref_slice %arg4[%18] : memref<8x!tpu.dma_semaphore, #tpu.memory_space<semaphore_mem>> -> memref<1x!tpu.dma_semaphore, #tpu.memory_space<semaphore_mem>>
      %24 = tpu.memref_squeeze %23 : memref<1x!tpu.dma_semaphore, #tpu.memory_space<semaphore_mem>> -> memref<!tpu.dma_semaphore, #tpu.memory_space<semaphore_mem>>
      tpu.enqueue_dma source(%20 : memref<128xf32, #tpu.memory_space<any>>) target(%22 : memref<128xf32, #tpu.memory_space<vmem>>) target_semaphore(%24 : memref<!tpu.dma_semaphore, #tpu.memory_space<semaphore_mem>>)
    }
    %c8_i32_0 = arith.constant 8 : i32
    %c0_i32_1 = arith.constant 0 : i32
    %c8_i32_2 = arith.constant 8 : i32
    %2 = arith.addi %c0_i32_1, %c8_i32_2 : i32
    %c1_i32_3 = arith.constant 1 : i32
    scf.for %arg5 = %c0_i32_1 to %2 step %c1_i32_3  : i32 {
      %c1_i32_9 = arith.constant 1 : i32
      %4 = arith.muli %arg5, %c1_i32_9 : i32
      %c8_i32_10 = arith.constant 8 : i32
      %5 = arith.addi %c8_i32_10, %4 : i32
      %c8_i32_11 = arith.constant 8 : i32
      %c0_i32_12 = arith.constant 0 : i32
      %6 = arith.cmpi eq, %c8_i32_11, %c0_i32_12 : i32
      %c1_i32_13 = arith.constant 1 : i32
      %7 = arith.select %6, %c1_i32_13, %c8_i32_11 : i32
      %8 = arith.remsi %5, %7 : i32
      %c0_i32_14 = arith.constant 0 : i32
      %9 = arith.cmpi ne, %8, %c0_i32_14 : i32
      %c0_i32_15 = arith.constant 0 : i32
      %10 = arith.cmpi slt, %8, %c0_i32_15 : i32
      %c0_i32_16 = arith.constant 0 : i32
      %11 = arith.cmpi slt, %7, %c0_i32_16 : i32
      %12 = arith.xori %10, %11 : i1
      %13 = arith.andi %12, %9 : i1
      %14 = arith.addi %8, %7 : i32
      %15 = arith.select %13, %14, %8 : i32
      %c0_i32_17 = arith.constant 0 : i32
      %c0_i32_18 = arith.constant 0 : i32
      %c0_i32_19 = arith.constant 0 : i32
      %16 = tpu.memref_slice %arg2[%c0_i32_17, %c0_i32_19] : memref<32x128xf32, #tpu.memory_space<any>> -> memref<1x128xf32, #tpu.memory_space<any>>
      %17 = tpu.memref_squeeze %16 : memref<1x128xf32, #tpu.memory_space<any>> -> memref<128xf32, #tpu.memory_space<any>>
      %c0_i32_20 = arith.constant 0 : i32
      %18 = tpu.memref_slice %arg3[%c0_i32_18, %c0_i32_20] : memref<16x128xf32, #tpu.memory_space<vmem>> -> memref<1x128xf32, #tpu.memory_space<vmem>>
      %19 = tpu.memref_squeeze %18 : memref<1x128xf32, #tpu.memory_space<vmem>> -> memref<128xf32, #tpu.memory_space<vmem>>
      %20 = tpu.memref_slice %arg4[%15] : memref<8x!tpu.dma_semaphore, #tpu.memory_space<semaphore_mem>> -> memref<1x!tpu.dma_semaphore, #tpu.memory_space<semaphore_mem>>
      %21 = tpu.memref_squeeze %20 : memref<1x!tpu.dma_semaphore, #tpu.memory_space<semaphore_mem>> -> memref<!tpu.dma_semaphore, #tpu.memory_space<semaphore_mem>>
      tpu.wait_dma2 semaphore(%21 : memref<!tpu.dma_semaphore, #tpu.memory_space<semaphore_mem>>) src(%17 : memref<128xf32, #tpu.memory_space<any>>) dst(%19 : memref<128xf32, #tpu.memory_space<vmem>>)
      %22 = arith.addi %0, %5 : i32
      %23 = arith.index_cast %22 : i32 to index
      %24 = memref.load %arg1[%23] : memref<16xi32, #tpu.memory_space<smem>>
      %c8_i32_21 = arith.constant 8 : i32
      %c0_i32_22 = arith.constant 0 : i32
      %25 = arith.cmpi eq, %c8_i32_21, %c0_i32_22 : i32
      %c1_i32_23 = arith.constant 1 : i32
      %26 = arith.select %25, %c1_i32_23, %c8_i32_21 : i32
      %27 = arith.remsi %5, %26 : i32
      %c0_i32_24 = arith.constant 0 : i32
      %28 = arith.cmpi ne, %27, %c0_i32_24 : i32
      %c0_i32_25 = arith.constant 0 : i32
      %29 = arith.cmpi slt, %27, %c0_i32_25 : i32
      %c0_i32_26 = arith.constant 0 : i32
      %30 = arith.cmpi slt, %26, %c0_i32_26 : i32
      %31 = arith.xori %29, %30 : i1
      %32 = arith.andi %31, %28 : i1
      %33 = arith.addi %27, %26 : i32
      %34 = arith.select %32, %33, %27 : i32
      %c0_i32_27 = arith.constant 0 : i32
      %35 = tpu.memref_slice %arg2[%24, %c0_i32_27] : memref<32x128xf32, #tpu.memory_space<any>> -> memref<1x128xf32, #tpu.memory_space<any>>
      %36 = tpu.memref_squeeze %35 : memref<1x128xf32, #tpu.memory_space<any>> -> memref<128xf32, #tpu.memory_space<any>>
      %c0_i32_28 = arith.constant 0 : i32
      %37 = tpu.memref_slice %arg3[%5, %c0_i32_28] : memref<16x128xf32, #tpu.memory_space<vmem>> -> memref<1x128xf32, #tpu.memory_space<vmem>>
      %38 = tpu.memref_squeeze %37 : memref<1x128xf32, #tpu.memory_space<vmem>> -> memref<128xf32, #tpu.memory_space<vmem>>
      %39 = tpu.memref_slice %arg4[%34] : memref<8x!tpu.dma_semaphore, #tpu.memory_space<semaphore_mem>> -> memref<1x!tpu.dma_semaphore, #tpu.memory_space<semaphore_mem>>
      %40 = tpu.memref_squeeze %39 : memref<1x!tpu.dma_semaphore, #tpu.memory_space<semaphore_mem>> -> memref<!tpu.dma_semaphore, #tpu.memory_space<semaphore_mem>>
      tpu.enqueue_dma source(%36 : memref<128xf32, #tpu.memory_space<any>>) target(%38 : memref<128xf32, #tpu.memory_space<vmem>>) target_semaphore(%40 : memref<!tpu.dma_semaphore, #tpu.memory_space<semaphore_mem>>)
    }
    %c8_i32_4 = arith.constant 8 : i32
    %c0_i32_5 = arith.constant 0 : i32
    %c8_i32_6 = arith.constant 8 : i32
    %3 = arith.addi %c0_i32_5, %c8_i32_6 : i32
    %c1_i32_7 = arith.constant 1 : i32
    scf.for %arg5 = %c0_i32_5 to %3 step %c1_i32_7  : i32 {
      %c1_i32_9 = arith.constant 1 : i32
      %4 = arith.muli %arg5, %c1_i32_9 : i32
      %c0_i32_10 = arith.constant 0 : i32
      %5 = arith.addi %c0_i32_10, %4 : i32
      %c0_i32_11 = arith.constant 0 : i32
      %c0_i32_12 = arith.constant 0 : i32
      %c0_i32_13 = arith.constant 0 : i32
      %6 = tpu.memref_slice %arg2[%c0_i32_11, %c0_i32_13] : memref<32x128xf32, #tpu.memory_space<any>> -> memref<1x128xf32, #tpu.memory_space<any>>
      %7 = tpu.memref_squeeze %6 : memref<1x128xf32, #tpu.memory_space<any>> -> memref<128xf32, #tpu.memory_space<any>>
      %c0_i32_14 = arith.constant 0 : i32
      %8 = tpu.memref_slice %arg3[%c0_i32_12, %c0_i32_14] : memref<16x128xf32, #tpu.memory_space<vmem>> -> memref<1x128xf32, #tpu.memory_space<vmem>>
      %9 = tpu.memref_squeeze %8 : memref<1x128xf32, #tpu.memory_space<vmem>> -> memref<128xf32, #tpu.memory_space<vmem>>
      %10 = tpu.memref_slice %arg4[%5] : memref<8x!tpu.dma_semaphore, #tpu.memory_space<semaphore_mem>> -> memref<1x!tpu.dma_semaphore, #tpu.memory_space<semaphore_mem>>
      %11 = tpu.memref_squeeze %10 : memref<1x!tpu.dma_semaphore, #tpu.memory_space<semaphore_mem>> -> memref<!tpu.dma_semaphore, #tpu.memory_space<semaphore_mem>>
      tpu.wait_dma2 semaphore(%11 : memref<!tpu.dma_semaphore, #tpu.memory_space<semaphore_mem>>) src(%7 : memref<128xf32, #tpu.memory_space<any>>) dst(%9 : memref<128xf32, #tpu.memory_space<vmem>>)
    }
    %c8_i32_8 = arith.constant 8 : i32
    return
  }
  func.func @transform_1(%arg0: i32, %arg1: memref<16xi32, #tpu.memory_space<smem>>) -> (i32, i32) {
    %c0_i32 = arith.constant 0 : i32
    %c0_i32_0 = arith.constant 0 : i32
    return %arg0, %c0_i32 : i32, i32
  }
}

</mosaic_0001>

<bundles_post_ra>
// kernel: tpu_custom_call.1
= control target key start
LH: loop header
LB: loop body
LE: loop exit
PB: predicated region body
PF: predicated region fallthrough
CT: control target
= control target key end

     0   :  { %s339_s9 = smov [#allocation4]   ;;  %s426_s0 = inlined_call_operand.hbm [shape: s32[16], index: 0, kind: input, shape index: {}]   ;;  %s427_s1 = inlined_call_operand.hbm [shape: f32[32,128], index: 1, kind: input, shape index: {}]   ;;  %s428_s2 = inlined_call_operand.hbm [shape: f32[16,128], index: 2, kind: output, shape index: {}]  }
   0x1   :  { %8 = dma.hbm_to_smem %s426_s0, 16, %s339_s9, [#allocation3] }
   0x2   :  { %319 = dma.done.wait [#allocation3], 16 }
   0x3   :  { %320 = vsyncadd [#allocation3], 4294967280 }
   0x4   :  { %10 = sfence }
   0x5   :  { %11 = vsyncpa [#allocation6], 0  ;;  %s361_s12 = smov 0  }
   0x6 LB: > { %s20_s13 = sld [smem:[#allocation4 + %s329_s12]]  ;;  %p21_p0 = scmp.lt.s32.totalorder %s329_s12, 0  ;;  %s329_s12 = sphi %s361_s12, %s18_s12  }
   0x7   : > { %s22_s14 = ssub.s32 0, %s329_s12  ;;  %s35_s17 = scalar_lea.vmem [#allocation5], %s329_s12 }
   0x8   : > { %s191_s0 = smin.u32 %s329_s12, %s22_s14  ;;  %s44_s18 = sshll.u32 %s35_s17, 4  ;;  %s45_s18 = int_to_ptr.vmem [resolvable:$true] %s44_s18 }
   0x9   : > { %s24_s15 = sand.u32 7, %s191_s0   ;;  %s245_s28 = scalar_lea.hbm %s427_s1, 512 }
   0xa   : > { %s25_s16 = ssub.s32 0, %s24_s15 }
   0xb   : > { %s430_s16 = smov (!%p21_p0, %s25_s16), %s24_s15 }
   0xc   : > { %s194_s19 = sshll.u32 %s20_s13, 4  ;;  %p193_p1 = scmp.lt.s32.totalorder %s430_s16, 0 }
   0xd   : > { %s31_s20 = sadd.s32 8, %s430_s16  ;;  %s34_s23 = scalar_lea.hbm %s427_s1, %s194_s19 }
   0xe   : > { %s432_s20 = smov (!%p193_p1, %s31_s20), %s430_s16  ;;  %s243_s25 = scalar_lea.hbm %s34_s23, 16 }
   0xf   : > { %s36_s24 = scalar_lea.sflag [#allocation2], %s432_s20  ;;  %p244_p2 = scmp.ne.s32.totalorder %s34_s23, %s243_s25 }
  0x10   : > { %p246_p3 = scmp.lt.s32.totalorder %s34_s23, %s427_s1  ;;  %p247_p4 = scmp.lt.s32.totalorder %s245_s28, %s243_s25 }
  0x12   : > { %p248_p5 = por %p247_p4, %p246_p3 }
  0x14   : > { %p249_p6 = pnand %p248_p5, %p244_p2 }
  0x16   : > { %252 = shalt.err (!%p249_p6)  }
  0x17   : > { %s253_s5 = scalar_lea.vmem %s45_s18, 16  ;;  %s340_s6 = smov [#allocation5]  }
  0x18   : > { %p254_p7 = scmp.ne.s32.totalorder %s45_s18, %s253_s5  ;;  %s255_s7 = sshll.u32 %s340_s6, 4  ;;  %s384_s7 = int_to_ptr.vmem [resolvable:$false] %s255_s7 }
  0x19   : > { %s387_s8 = scalar_lea.vmem %s384_s7, 256  ;;  %p258_p8 = scmp.lt.s32.totalorder %s45_s18, %s384_s7 }
  0x1a   : > { %p259_p9 = scmp.lt.s32.totalorder %s387_s8, %s253_s5 }
  0x1c   : > { %p260_p10 = por %p259_p9, %p258_p8 }
  0x1e   : > { %p261_p11 = pnand %p260_p10, %p254_p7 }
  0x20   : > { %264 = shalt.err (!%p261_p11)  }
  0x21   : > { %47 = dma.hbm_to_vmem [thread:$0]  %s34_s23, 16, %s45_s18, %s36_s24 }
  0x22   : > { %s18_s12 = sadd.s32 1, %s329_s12  }
  0x23   : > { %p15_p12 = scmp.ge.s32.totalorder %s18_s12, 8  }
  0x24   :  { %s394_s9 = smov (%p15_p12), 0  }
  0x25   :  { %17 = sbr.rel (!%p15_p12) target bundleno = 6 (0x6), region = 63 }
  0x2a LB: > { %s54_s10 = sadd.s32 8, %s333_s9  ;;  %s333_s9 = sphi %s394_s9, %s53_s9  }
  0x2b   : > { %p55_p13 = scmp.lt.s32.totalorder %s54_s10, 0  ;;  %s56_s11 = ssub.s32 0, %s54_s10 }
  0x2c   : > { %s195_s13 = smin.u32 %s56_s11, %s54_s10 }
  0x2d   : > { %s58_s14 = sand.u32 7, %s195_s13  }
  0x2e   : > { %s59_s0 = ssub.s32 0, %s58_s14 }
  0x2f   : > { %s434_s0 = smov (!%p55_p13, %s59_s0), %s58_s14 }
  0x30   : > { %p197_p0 = scmp.lt.s32.totalorder %s434_s0, 0  ;;  %s65_s15 = sadd.s32 8, %s434_s0 }
  0x32   : > { %s436_s15 = smov (!%p197_p0, %s65_s15), %s434_s0 }
  0x33   : > { %s67_s12 = scalar_lea.sflag [#allocation2], %s436_s15 }
  0x34   : > { %321 = dma.done.wait %s67_s12, 16 }
  0x35   : > { %322 = vsyncadd %s67_s12, 4294967280  ;;  %s71_s16 = sld [smem:[#allocation4 + %s54_s10]]  ;;  %s173_s17 = scalar_lea.vmem [#allocation5], %s333_s9 }
  0x36   : > { %s174_s18 = scalar_lea.vmem %s173_s17, 8 [#allocation5] }
  0x37   : > { %s82_s19 = sshll.u32 %s174_s18, 4  ;;  %s83_s19 = int_to_ptr.vmem [resolvable:$true] %s82_s19 }
  0x3b   : > { %s198_s20 = sshll.u32 %s71_s16, 4 }
  0x3c   : > { %s73_s23 = scalar_lea.hbm %s427_s1, %s198_s20 }
  0x3d   : > { %s265_s24 = scalar_lea.hbm %s73_s23, 16  ;;  %p268_p2 = scmp.lt.s32.totalorder %s73_s23, %s427_s1 }
  0x3e   : > { %p266_p1 = scmp.ne.s32.totalorder %s73_s23, %s265_s24  ;;  %p269_p3 = scmp.lt.s32.totalorder %s245_s28, %s265_s24 }
  0x40   : > { %p270_p4 = por %p269_p3, %p268_p2 }
  0x42   : > { %p271_p5 = pnand %p270_p4, %p266_p1 }
  0x44   : > { %274 = shalt.err (!%p271_p5)  }
  0x45   : > { %s275_s30 = scalar_lea.vmem %s83_s19, 16  ;;  %p280_p7 = scmp.lt.s32.totalorder %s83_s19, %s384_s7 }
  0x46   : > { %p276_p6 = scmp.ne.s32.totalorder %s83_s19, %s275_s30  ;;  %p281_p8 = scmp.lt.s32.totalorder %s387_s8, %s275_s30 }
  0x48   : > { %p282_p9 = por %p281_p8, %p280_p7 }
  0x4a   : > { %p283_p10 = pnand %p282_p9, %p276_p6 }
  0x4c   : > { %286 = shalt.err (!%p283_p10)  }
  0x4d   : > { %85 = dma.hbm_to_vmem [thread:$0]  %s73_s23, 16, %s83_s19, %s67_s12 }
  0x4e   : > { %s53_s9 = sadd.s32 1, %s333_s9  }
  0x4f   : > { %p50_p11 = scmp.ge.s32.totalorder %s53_s9, 8  }
  0x50   :  { %s335_s3 = smov (%p50_p11), 0  }
  0x51   :  { %52 = sbr.rel (!%p50_p11) target bundleno = 42 (0x2a), region = 74 }
  0x56 LB: > { %s92_s4 = scalar_lea.sflag [#allocation2], %s337_s3  ;;  %s337_s3 = sphi %s335_s3, %s91_s3  }
  0x57   : > { %323 = dma.done.wait %s92_s4, 16 }
  0x58   : > { %324 = vsyncadd %s92_s4, 4294967280  ;;  %s91_s3 = sadd.s32 1, %s337_s3  }
  0x59   : > { %p88_p12 = scmp.ge.s32.totalorder %s91_s3, 8  }
  0x5a   :  { %p288_p13 = scmp.ne.s32.totalorder (%p88_p12), %s384_s7, %s387_s8  ;;  %p292_p0 = scmp.lt.s32.totalorder (%p88_p12), %s384_s7, %s384_s7 }
  0x5b   :  { %90 = sbr.rel (!%p88_p12) target bundleno = 86 (0x56), region = 85  ;;  %p293_p1 = scmp.lt.s32.totalorder (%p88_p12), %s387_s8, %s387_s8 }
  0x5d   :  { %p294_p2 = por (%p88_p12), %p293_p1, %p292_p0 }
  0x5f   :  { %p295_p3 = pnand (%p88_p12), %p294_p2, %p288_p13 }
  0x61   :  { %298 = shalt.err (!%p295_p3)
}
  0x62   :  { %s341_s1 = smov 128   ;;  %s342_s28 = smov 8  }
  0x63   :  { %106 = dma.vmem_to_hbm [thread:$0]  %s384_s7, 256, %s428_s2, [#allocation6], %s341_s1, %s341_s1, %s342_s28  }
  0x64   :  { %325 = dma.done.wait [#allocation6], 256  }
  0x65   :  { %326 = vsyncadd [#allocation6], 4294967040 }
  0x66   :  { %110 = vsyncpa [#allocation6], 1 }
  0x67   :  { %111 = vsyncmov [#allocation2] }
  0x6a   :  { %s112_s9 = vpop.sfrf %111 }
  0x6b   :  { %p199_p4 = scmp.ne.s32.totalorder %s112_s9, 0 }
  0x6d   :  { %116 = shalt.err (%p199_p4)  }
  0x6e   :  { %118 = vsyncmov [#allocation2 + $0x1] }
  0x71   :  { %s119_s10 = vpop.sfrf %118 }
  0x72   :  { %p200_p5 = scmp.ne.s32.totalorder %s119_s10, 0 }
  0x74   :  { %123 = shalt.err (%p200_p5)  }
  0x75   :  { %125 = vsyncmov [#allocation2 + $0x2] }
  0x78   :  { %s126_s8 = vpop.sfrf %125 }
  0x79   :  { %p201_p6 = scmp.ne.s32.totalorder %s126_s8, 0 }
  0x7b   :  { %130 = shalt.err (%p201_p6)  }
  0x7c   :  { %132 = vsyncmov [#allocation2 + $0x3] }
  0x7f   :  { %s133_s11 = vpop.sfrf %132 }
  0x80   :  { %p202_p7 = scmp.ne.s32.totalorder %s133_s11, 0 }
  0x82   :  { %137 = shalt.err (%p202_p7)  }
  0x83   :  { %139 = vsyncmov [#allocation2 + $0x4] }
  0x86   :  { %s140_s2 = vpop.sfrf %139 }
  0x87   :  { %p203_p8 = scmp.ne.s32.totalorder %s140_s2, 0 }
  0x89   :  { %144 = shalt.err (%p203_p8)  }
  0x8a   :  { %146 = vsyncmov [#allocation2 + $0x5] }
  0x8d   :  { %s147_s7 = vpop.sfrf %146 }
  0x8e   :  { %p204_p9 = scmp.ne.s32.totalorder %s147_s7, 0 }
  0x90   :  { %151 = shalt.err (%p204_p9)  }
  0x91   :  { %153 = vsyncmov [#allocation2 + $0x6] }
  0x94   :  { %s154_s13 = vpop.sfrf %153 }
  0x95   :  { %p205_p10 = scmp.ne.s32.totalorder %s154_s13, 0 }
  0x97   :  { %158 = shalt.err (%p205_p10)  }
  0x98   :  { %160 = vsyncmov [#allocation2 + $0x7] }
  0x9b   :  { %s161_s14 = vpop.sfrf %160 }
  0x9c   :  { %p206_p11 = scmp.ne.s32.totalorder %s161_s14, 0 }
  0x9e   :  { %165 = shalt.err (%p206_p11)  }

</bundles_post_ra>
